<compile_context>
chip_gen: v6e
topology: v6e:2x2x1
jax: 0.10.0
libtpu: 0.0.40
codegen_flags: <defaults>
</compile_context>

<pallas_src>
import jax
import jax.numpy as jnp
from jax.experimental import pallas as pl
from jax.experimental.pallas import tpu as pltpu


def _round_up(v, m):
    return ((v + m - 1) // m) * m


def dna_cnn_kernel(x_ref, wt_ref, bc_ref, wl_ref, bl_ref, o_ref):
    # x_ref : (TB, S*C)      flattened input block (lane-dense)
    # wt_ref: (S*C, Lout*F)  block-Toeplitz conv weight (VMEM-resident)
    # bc_ref: (1, Lout*F)    conv bias broadcast over l (lane-dense row)
    # wl_ref: (1, Lout*F)    linear weight re-ordered to flatten index l*F + f
    # bl_ref: (1, 1)         linear bias
    # o_ref : (1, TB)        lane-dense output block (batch on the lane axis)
    y = jnp.dot(x_ref[...], wt_ref[...],
                preferred_element_type=jnp.float32)        # (TB, Lout*F) MXU
    y = jnp.maximum(y + bc_ref[...], 0.0)                  # bias + ReLU
    out = jnp.sum(y * wl_ref[...], axis=1)                 # flatten+Linear (TB,)
    o_ref[...] = (out[None, :] + bl_ref[0, 0]).astype(o_ref.dtype)


def dna_cnn_forward(x, conv_w, conv_b, lin_w, lin_b, *, kernel_size,
                    max_block_b=1024):
    """x: (B, S, 4) float32. Returns (B, 1) float32."""
    b, s, c = x.shape
    f = conv_w.shape[0]
    l_out = s - kernel_size + 1

    # ---- Wrapper-side re-layouts (tiny, done once) -------------------------
    # Block-Toeplitz conv weight: W_toe[s*C + c, l*F + f] = conv_w[f, c, s - l]
    # for 0 <= s - l < K, else 0, so conv_out[b, l, f] = x2d[b] @ W_toe[:, l*F+f].
    s_idx = jnp.arange(s)[:, None]                          # (S, 1)
    l_idx = jnp.arange(l_out)[None, :]                      # (1, Lout)
    k_idx = s_idx - l_idx                                   # (S, Lout)
    valid = (k_idx >= 0) & (k_idx < kernel_size)
    k_cl = jnp.clip(k_idx, 0, kernel_size - 1)
    w_g = conv_w[:, :, k_cl]                                # (F, C, S, Lout)
    w_g = jnp.where(valid[None, None, :, :], w_g, 0.0)
    w_toe = jnp.transpose(w_g, (2, 1, 3, 0)).reshape(s * c, l_out * f)
    w_toe = w_toe.astype(jnp.float32)

    bc_row = jnp.broadcast_to(conv_b[None, :], (l_out, f)).reshape(1, l_out * f)
    # PyTorch flatten index = f*Lout + l ; re-order to (l, f) flat order.
    wl_row = lin_w.reshape(f, l_out).T.reshape(1, l_out * f)
    bl = lin_b.reshape(1, 1)

    x2d = x.reshape(b, s * c)          # contiguous reshape, lane-dense rows

    # ---- Batch tiling -------------------------------------------------------
    if b <= 128:
        tb = b                         # block == full array dim (8,128 rule ok)
    else:
        # Multiple of 128 (unmasked lane-dense output stores), capped, and the
        # grid kept >= 2 steps so v7x's two TensorCores can split the batch.
        tb = min(max_block_b, 128 * pl.cdiv(pl.cdiv(b, 2), 128))
        tb = max(tb, 128)
    grid = (pl.cdiv(b, tb),)

    # ---- VMEM budget from the real double-buffered footprint ---------------
    lane = lambda n: _round_up(n, 128)
    sub = lambda n: _round_up(n, 8)
    x_blk = sub(tb) * lane(s * c) * 4
    o_blk = sub(1) * lane(tb) * 4
    y_tmp = sub(tb) * lane(l_out * f) * 4
    params = (sub(s * c) * lane(l_out * f) + 3 * sub(1) * lane(l_out * f)) * 4
    vmem_need = 2 * (x_blk + o_blk) + 2 * y_tmp + 2 * params + (2 << 20)
    vmem_limit = int(min(64 * 1024 * 1024, max(vmem_need, 8 * 1024 * 1024)))

    flops = 2 * b * (s * c) * (l_out * f) + 3 * b * (l_out * f)
    bytes_accessed = (int(x2d.size) + int(w_toe.size) + int(bc_row.size)
                      + int(wl_row.size) + int(bl.size) + b) * 4

    out_row = pl.pallas_call(
        dna_cnn_kernel,
        out_shape=jax.ShapeDtypeStruct((1, b), jnp.float32),
        grid_spec=pltpu.PrefetchScalarGridSpec(
            num_scalar_prefetch=0,
            grid=grid,
            in_specs=[
                pl.BlockSpec((tb, s * c), lambda i: (i, 0)),            # x2d
                pl.BlockSpec((s * c, l_out * f), lambda i: (0, 0)),     # W_toe
                pl.BlockSpec((1, l_out * f), lambda i: (0, 0)),         # bc
                pl.BlockSpec((1, l_out * f), lambda i: (0, 0)),         # wl
                pl.BlockSpec((1, 1), lambda i: (0, 0)),                 # bl
            ],
            out_specs=pl.BlockSpec((1, tb), lambda i: (0, i)),
        ),
        compiler_params=pltpu.CompilerParams(
            dimension_semantics=("parallel",),   # v7x: 2 TCs split the batch
            vmem_limit_bytes=vmem_limit,
        ),
        cost_estimate=pl.CostEstimate(
            flops=int(flops), transcendentals=0,
            bytes_accessed=int(bytes_accessed)),
    )(x2d, w_toe, bc_row, wl_row, bl)
    return out_row.reshape(b, 1)


def dna_cnn_reference(x, conv_w, conv_b, lin_w, lin_b, *, kernel_size):
    """Pure-JAX reference matching PyTorch exactly."""
    b, s, c = x.shape
    f = conv_w.shape[0]
    l_out = s - kernel_size + 1
    xp = jnp.transpose(x, (0, 2, 1))                     # (B, C, S)
    y = jnp.zeros((b, f, l_out), jnp.float32)
    for k in range(kernel_size):
        # y[b,f,l] += sum_c x[b,c,l+k] * w[f,c,k]
        y = y + jnp.einsum('bcl,fc->bfl', xp[:, :, k:k + l_out], conv_w[:, :, k])
    y = jnp.maximum(y + conv_b[None, :, None], 0.0)
    flat = y.reshape(b, f * l_out)
    return flat @ lin_w.T + lin_b[None, :]


if __name__ == "__main__":
    seq_len = 16
    num_filters = 32
    kernel_size = 3
    l_out = seq_len - kernel_size + 1

    key = jax.random.PRNGKey(0)
    kx, kw1, kb1, kw2, kb2, kx2, kx3 = jax.random.split(key, 7)

    # Deterministic parameter init (shapes match nn.Conv1d / nn.Linear).
    conv_w = jax.random.normal(kw1, (num_filters, 4, kernel_size),
                               dtype=jnp.float32) * 0.1
    conv_b = jax.random.normal(kb1, (num_filters,), dtype=jnp.float32) * 0.1
    lin_w = jax.random.normal(kw2, (1, num_filters * l_out),
                              dtype=jnp.float32) * 0.05
    lin_b = jax.random.normal(kb2, (1,), dtype=jnp.float32) * 0.05

    # Test 1: small batch (single grid step, TB == B == 2).
    batch = 2
    x = jax.random.normal(kx, (batch, seq_len, 4), dtype=jnp.float32)
    out = dna_cnn_forward(x, conv_w, conv_b, lin_w, lin_b,
                          kernel_size=kernel_size)
    out = jax.block_until_ready(out)
    ref = dna_cnn_reference(x, conv_w, conv_b, lin_w, lin_b,
                            kernel_size=kernel_size)
    assert out.shape == (batch, 1), out.shape
    assert jnp.allclose(out, ref, atol=1e-4, rtol=1e-4), (out, ref)

    # Test 2: multi-step grid with a partial last block (TB=128, B=200).
    batch2 = 200
    x2 = jax.random.normal(kx2, (batch2, seq_len, 4), dtype=jnp.float32)
    out2 = dna_cnn_forward(x2, conv_w, conv_b, lin_w, lin_b,
                           kernel_size=kernel_size)
    out2 = jax.block_until_ready(out2)
    ref2 = dna_cnn_reference(x2, conv_w, conv_b, lin_w, lin_b,
                             kernel_size=kernel_size)
    assert out2.shape == (batch2, 1), out2.shape
    assert jnp.allclose(out2, ref2, atol=1e-4, rtol=1e-4)

    # Test 3: larger batch exercising the big-tile path (TB=768, 2 grid steps).
    batch3 = 1536
    x3 = jax.random.normal(kx3, (batch3, seq_len, 4), dtype=jnp.float32)
    out3 = dna_cnn_forward(x3, conv_w, conv_b, lin_w, lin_b,
                           kernel_size=kernel_size)
    out3 = jax.block_until_ready(out3)
    ref3 = dna_cnn_reference(x3, conv_w, conv_b, lin_w, lin_b,
                             kernel_size=kernel_size)
    assert out3.shape == (batch3, 1), out3.shape
    assert jnp.allclose(out3, ref3, atol=1e-4, rtol=1e-4)

    print("KERNEL_OK")
</pallas_src>

<mosaic_0001>
module attributes {stable_mosaic.version = 11 : i64} {
  func.func @dna_cnn_kernel(%arg0: i32, %arg1: memref<2x64xf32, #tpu.memory_space<vmem>>, %arg2: memref<64x448xf32, #tpu.memory_space<vmem>>, %arg3: memref<1x448xf32, #tpu.memory_space<vmem>>, %arg4: memref<1x448xf32, #tpu.memory_space<vmem>>, %arg5: memref<1x1xf32, #tpu.memory_space<vmem>>, %arg6: memref<1x2xf32, #tpu.memory_space<vmem>>) attributes {dimension_semantics = [#tpu.dimension_semantics<parallel>], iteration_bounds = array<i64: 1>, scalar_prefetch = 0 : i64, scratch_operands = 0 : i64, tpu.core_type = #tpu.core_type<tc>, window_params = [{transform_indices = @transform_0, window_bounds = array<i64: 2, 64>}, {pipeline_mode = #tpu.pipeline_mode<synchronous>, transform_indices = @transform_1, window_bounds = array<i64: 64, 448>}, {pipeline_mode = #tpu.pipeline_mode<synchronous>, transform_indices = @transform_2, window_bounds = array<i64: 1, 448>}, {pipeline_mode = #tpu.pipeline_mode<synchronous>, transform_indices = @transform_3, window_bounds = array<i64: 1, 448>}, {pipeline_mode = #tpu.pipeline_mode<synchronous>, transform_indices = @transform_4, window_bounds = array<i64: 1, 1>}, {transform_indices = @transform_5, window_bounds = array<i64: 1, 2>}]} {
    %c0 = arith.constant 0 : index
    %c0_0 = arith.constant 0 : index
    %0 = vector.load %arg1[%c0, %c0_0] : memref<2x64xf32, #tpu.memory_space<vmem>>, vector<2x64xf32>
    %c0_1 = arith.constant 0 : index
    %c0_2 = arith.constant 0 : index
    %1 = vector.load %arg2[%c0_1, %c0_2] : memref<64x448xf32, #tpu.memory_space<vmem>>, vector<64x448xf32>
    %cst = arith.constant dense<0.000000e+00> : vector<2x448xf32>
    %2 = tpu.matmul %0, %1, %cst {dimension_numbers = #tpu.dot_dimension_numbers<[1], [0], [0], [1], [0, 0, 1, 1], [], []>} : vector<2x64xf32>, vector<64x448xf32>, vector<2x448xf32> -> vector<2x448xf32>
    %c0_3 = arith.constant 0 : index
    %c0_4 = arith.constant 0 : index
    %3 = vector.load %arg3[%c0_3, %c0_4] : memref<1x448xf32, #tpu.memory_space<vmem>>, vector<1x448xf32>
    %4 = vector.broadcast %3 : vector<1x448xf32> to vector<2x448xf32>
    %5 = arith.addf %2, %4 : vector<2x448xf32>
    %cst_5 = arith.constant 0.000000e+00 : f32
    %6 = vector.broadcast %cst_5 : f32 to vector<2x448xf32>
    %7 = arith.maximumf %5, %6 : vector<2x448xf32>
    %c0_6 = arith.constant 0 : index
    %c0_7 = arith.constant 0 : index
    %8 = vector.load %arg4[%c0_6, %c0_7] : memref<1x448xf32, #tpu.memory_space<vmem>>, vector<1x448xf32>
    %9 = vector.broadcast %8 : vector<1x448xf32> to vector<2x448xf32>
    %10 = arith.mulf %7, %9 : vector<2x448xf32>
    %cst_8 = arith.constant dense<0.000000e+00> : vector<2xf32>
    %11 = vector.multi_reduction <add>, %10, %cst_8 [1] : vector<2x448xf32> to vector<2xf32>
    %12 = vector.shape_cast %11 : vector<2xf32> to vector<1x2xf32>
    %c0_9 = arith.constant 0 : index
    %c0_10 = arith.constant 0 : index
    %13 = vector.load %arg5[%c0_9, %c0_10] : memref<1x1xf32, #tpu.memory_space<vmem>>, vector<1x1xf32>
    %14 = vector.extract %13[0, 0] : f32 from vector<1x1xf32>
    %15 = vector.broadcast %14 : f32 to vector<1x2xf32>
    %16 = arith.addf %12, %15 : vector<1x2xf32>
    %c0_11 = arith.constant 0 : index
    %c0_12 = arith.constant 0 : index
    %17 = vector.load %arg6[%c0_11, %c0_12] : memref<1x2xf32, #tpu.memory_space<vmem>>, vector<1x2xf32>
    tpu.vector_store %arg6[%c0_11, %c0_12], %16 {strides = array<i32>} : memref<1x2xf32, #tpu.memory_space<vmem>>, vector<1x2xf32>,
    return
  }
  func.func @transform_0(%arg0: i32) -> (i32, i32) {
    %c0_i32 = arith.constant 0 : i32
    %c0_i32_0 = arith.constant 0 : i32
    return %arg0, %c0_i32 : i32, i32
  }
  func.func @transform_1(%arg0: i32) -> (i32, i32) {
    %c0_i32 = arith.constant 0 : i32
    %c0_i32_0 = arith.constant 0 : i32
    %c0_i32_1 = arith.constant 0 : i32
    return %c0_i32, %c0_i32_0 : i32, i32
  }
  func.func @transform_2(%arg0: i32) -> (i32, i32) {
    %c0_i32 = arith.constant 0 : i32
    %c0_i32_0 = arith.constant 0 : i32
    %c0_i32_1 = arith.constant 0 : i32
    return %c0_i32, %c0_i32_0 : i32, i32
  }
  func.func @transform_3(%arg0: i32) -> (i32, i32) {
    %c0_i32 = arith.constant 0 : i32
    %c0_i32_0 = arith.constant 0 : i32
    %c0_i32_1 = arith.constant 0 : i32
    return %c0_i32, %c0_i32_0 : i32, i32
  }
  func.func @transform_4(%arg0: i32) -> (i32, i32) {
    %c0_i32 = arith.constant 0 : i32
    %c0_i32_0 = arith.constant 0 : i32
    %c0_i32_1 = arith.constant 0 : i32
    return %c0_i32, %c0_i32_0 : i32, i32
  }
  func.func @transform_5(%arg0: i32) -> (i32, i32) {
    %c0_i32 = arith.constant 0 : i32
    %c0_i32_0 = arith.constant 0 : i32
    return %c0_i32, %arg0 : i32, i32
  }
}

</mosaic_0001>

<bundles_post_ra>
// kernel: tpu_custom_call.1
= control target key start
LH: loop header
LB: loop body
LE: loop exit
PB: predicated region body
PF: predicated region fallthrough
CT: control target
= control target key end

     0   :  { %s484_s0 = inlined_call_operand.hbm [shape: f32[2,64], index: 0, kind: input, shape index: {}]   ;;  %s485_s1 = inlined_call_operand.hbm [shape: f32[64,448], index: 1, kind: input, shape index: {}]   ;;  %s486_s2 = inlined_call_operand.vmem [shape: f32[1,448], index: 2, kind: input, shape index: {}]   ;;  %s487_s3 = inlined_call_operand.hbm [shape: f32[1,448], index: 3, kind: input, shape index: {}]   ;;  %s488_s4 = inlined_call_operand.<no memory space> [shape: f32[1,1], index: 4, kind: input, shape index: {}]   ;;  %s489_s5 = inlined_call_operand.hbm [shape: f32[1,2], index: 5, kind: output, shape index: {}]  }
   0x1   :  { %v10_v0 = vstv %s488_s4 }
   0x2   :  { %11 = vst [vmem:[#allocation2] sm:$0x1] %v10_v0 }
   0x3   :  { %12 = vsyncpa [#allocation4], 0 }
   0x4   :  { %13 = vsyncpa [#allocation7], 0 }
   0x5   :  { %14 = vsyncpa [#allocation5], 0  ;;  %s429_s20 = smov [#allocation6]  }
   0x6   :  { %s30_s21 = sshll.u32 %s429_s20, 4  ;;  %s31_s21 = int_to_ptr.vmem [resolvable:$true] %s30_s21 }
   0x7   :  { %s351_s22 = scalar_lea.vmem %s31_s21, 4096  ;;  %p356_p1 = scmp.lt.s32.totalorder %s31_s21, %s31_s21 }
   0x8   :  { %p352_p0 = scmp.ne.s32.totalorder %s31_s21, %s351_s22  ;;  %p357_p2 = scmp.lt.s32.totalorder %s351_s22, %s351_s22 }
   0xa   :  { %p358_p3 = por %p357_p2, %p356_p1 }
   0xc   :  { %p359_p4 = pnand %p358_p3, %p352_p0 }
   0xe   :  { %362 = shalt.err (!%p359_p4)
}
   0xf   :  { %s430_s23 = smov 512   ;;  %s431_s24 = smov 32  }
  0x10   :  { %36 = dma.hbm_to_vmem [thread:$0]  %s485_s1, 4096, %s31_s21, [#allocation7], %s430_s23, %s430_s23, %s431_s24  }
  0x11   :  { %s432_s4 = smov [#allocation3]   ;;  %s433_s28 = smov [#allocation8]  }
  0x12   :  { %s21_s27 = sshll.u32 %s432_s4, 4  ;;  %s45_s29 = sshll.u32 %s433_s28, 4  ;;  %s22_s27 = int_to_ptr.vmem [resolvable:$true] %s21_s27  ;;  %s46_s29 = int_to_ptr.vmem [resolvable:$true] %s45_s29 }
  0x13   :  { %s371_s30 = scalar_lea.vmem %s22_s27, 32  ;;  %p376_p6 = scmp.lt.s32.totalorder %s22_s27, %s22_s27 }
  0x14   :  { %p372_p5 = scmp.ne.s32.totalorder %s22_s27, %s371_s30  ;;  %p377_p7 = scmp.lt.s32.totalorder %s371_s30, %s371_s30 }
  0x16   :  { %p378_p8 = por %p377_p7, %p376_p6 }
  0x18   :  { %p379_p9 = pnand %p378_p8, %p372_p5 }
  0x1a   :  { %382 = shalt.err (!%p379_p9)
}
  0x1b   :  { %24 = dma.hbm_to_vmem [thread:$0]  %s484_s0, 32, %s22_s27, [#allocation4]  }
  0x1c   :  { %s391_s8 = scalar_lea.vmem %s46_s29, 64  ;;  %p396_p11 = scmp.lt.s32.totalorder %s46_s29, %s46_s29 }
  0x1d   :  { %p392_p10 = scmp.ne.s32.totalorder %s46_s29, %s391_s8  ;;  %p397_p12 = scmp.lt.s32.totalorder %s391_s8, %s391_s8 }
  0x1f   :  { %p398_p13 = por %p397_p12, %p396_p11 }
  0x21   :  { %p399_p0 = pnand %p398_p13, %p392_p10 }
  0x23   :  { %402 = shalt.err (!%p399_p0)
}
  0x24   :  { %48 = dma.hbm_to_vmem [thread:$0]  %s487_s3, 64, %s46_s29, [#allocation7]  }
  0x25   :  { %423 = dma.done.wait [#allocation4], 32  }
  0x26   :  { %424 = vsyncadd [#allocation4], 4294967264 }
  0x27   :  { %425 = dma.done.wait [#allocation7], 4160  }
  0x28   :  { %426 = vsyncadd [#allocation7], 4294963136  ;;  %v434_v1 = vmov 0.0   ;;  %v90_v2 = vld [vmem:[#allocation6 + $0xe8] sm:$0xff]  ;;  %v89_v3 = vld [vmem:[#allocation6 + $0xe0] sm:$0xff]  ;;  %vm115_vm0 = vcmask 523264   ;;  %v95_v36 = vlaneseq }
  0x29   :  { %183 = vmatprep.mubr.f32.mxu0 %v434_v1  ;;  %254 = vmatprep.mubr.f32.mxu1 %v434_v1  ;;  %v86_v4 = vld [vmem:[#allocation6 + $0xc8] sm:$0xff]  ;;  %v92_v5 = vld [vmem:[#allocation6 + $0xf8] sm:$0xff]  ;;  %v85_v6 = vld [vmem:[#allocation6 + $0xc0] sm:$0xff]  ;;  %vm291_vm1 = vcmask 1041408   ;;  %vm297_vm2 = vcmask 517120   ;;  %s435_s10 = smov [#allocation9]  }
  0x2a   :  { %135 = vmatprep.subr.mxu0 %v90_v2  ;;  %v91_v7 = vld [vmem:[#allocation6 + $0xf0] sm:$0xff]  ;;  %206 = vmatprep.subr.mxu1 %v92_v5  ;;  %v82_v8 = vld [vmem:[#allocation6 + $0xa8] sm:$0xff]  ;;  %v88_v9 = vld [vmem:[#allocation6 + $0xd8] sm:$0xff]  ;;  %v96_v37 = vshrl.u32 %v95_v36, 7  ;;  %s322_s11 = sshll.u32 %s435_s10, 4  ;;  %vm314_vm3 = vcmask 8192   ;;  %s323_s11 = int_to_ptr.vmem [resolvable:$true] %s322_s11 }
  0x2b   :  { %136 = vmatpush1.msra.mxu0 %v89_v3  ;;  %207 = vmatpush1.msra.mxu1 %v91_v7  ;;  %v81_v10 = vld [vmem:[#allocation6 + $0xa0] sm:$0xff]  ;;  %v87_v11 = vld [vmem:[#allocation6 + $0xd0] sm:$0xff]  ;;  %v84_v12 = vld [vmem:[#allocation6 + $0xb8] sm:$0xff]  ;;  %s403_s12 = scalar_lea.vmem %s323_s11, 16  ;;  %s407_s13 = scalar_lea.vmem %s323_s11, 32 }
  0x2c   :  { %137 = vmatprep.subr.mxu0 %v86_v4  ;;  %208 = vmatprep.subr.mxu1 %v88_v9  ;;  %v78_v13 = vld [vmem:[#allocation6 + $0x88] sm:$0xff]  ;;  %v83_v14 = vld [vmem:[#allocation6 + $0xb0] sm:$0xff]  ;;  %v77_v15 = vld [vmem:[#allocation6 + $0x80] sm:$0xff]  ;;  %v97_v38 = vsub.s32 0, %v96_v37  ;;  %v105_v40 = vsub.s32 2, %v96_v37  ;;  %v101_v41 = vsub.s32 1, %v96_v37  ;;  %p404_p1 = scmp.ne.s32.totalorder %s323_s11, %s403_s12  ;;  %p408_p2 = scmp.lt.s32.totalorder %s323_s11, %s323_s11 }
  0x2d   :  { %138 = vmatpush1.msra.mxu0 %v85_v6  ;;  %209 = vmatpush1.msra.mxu1 %v87_v11  ;;  %v80_v16 = vld [vmem:[#allocation6 + $0x98] sm:$0xff]  ;;  %v74_v17 = vld [vmem:[#allocation6 + $0x68] sm:$0xff]  ;;  %v79_v18 = vld [vmem:[#allocation6 + $0x90] sm:$0xff]  ;;  %v109_v42 = vsub.s32 3, %v96_v37  ;;  %v308_v11 = vand.u32 127, %v95_v36  ;;  %p409_p3 = scmp.lt.s32.totalorder %s407_s13, %s403_s12 }
  0x2e   :  { %139 = vmatprep.subr.mxu0 %v82_v8  ;;  %210 = vmatprep.subr.mxu1 %v84_v12  ;;  %v73_v19 = vld [vmem:[#allocation6 + $0x60] sm:$0xff]  ;;  %v76_v20 = vld [vmem:[#allocation6 + $0x78] sm:$0xff]  ;;  %v70_v21 = vld [vmem:[#allocation6 + $0x48] sm:$0xff] }
  0x2f   :  { %140 = vmatpush1.msra.mxu0 %v81_v10  ;;  %211 = vmatpush1.msra.mxu1 %v83_v14  ;;  %v75_v22 = vld [vmem:[#allocation6 + $0x70] sm:$0xff]  ;;  %v69_v23 = vld [vmem:[#allocation6 + $0x40] sm:$0xff]  ;;  %v72_v24 = vld [vmem:[#allocation6 + $0x58] sm:$0xff]  ;;  %p410_p4 = por %p409_p3, %p408_p2 }
  0x30   :  { %141 = vmatprep.subr.mxu0 %v78_v13  ;;  %212 = vmatprep.subr.mxu1 %v80_v16  ;;  %v66_v25 = vld [vmem:[#allocation6 + $0x28] sm:$0xff]  ;;  %v71_v26 = vld [vmem:[#allocation6 + $0x50] sm:$0xff]  ;;  %v65_v27 = vld [vmem:[#allocation6 + $0x20] sm:$0xff]  ;;  %v311_v13 = vsub.s32 %v308_v11, %v96_v37 }
  0x31   :  { %142 = vmatpush1.msra.mxu0 %v77_v15  ;;  %213 = vmatpush1.msra.mxu1 %v79_v18  ;;  %v68_v28 = vld [vmem:[#allocation6 + $0x38] sm:$0xff]  ;;  %v62_v29 = vld [vmem:[#allocation6 + $0x8] sm:$0xff]  ;;  %v67_v30 = vld [vmem:[#allocation6 + $0x30] sm:$0xff]  ;;  %p411_p5 = pnand %p410_p4, %p404_p1 }
  0x32   :  { %143 = vmatprep.subr.mxu0 %v74_v17  ;;  %214 = vmatprep.subr.mxu1 %v76_v20  ;;  %v61_v31 = vld [vmem:[#allocation6] sm:$0xff]  ;;  %v64_v32 = vld [vmem:[#allocation6 + $0x18] sm:$0xff]  ;;  %v63_v34 = vld [vmem:[#allocation6 + $0x10] sm:$0xff] }
  0x33   :  { %144 = vmatpush1.msra.mxu0 %v73_v19  ;;  %215 = vmatpush1.msra.mxu1 %v75_v22  ;;  %v60_v33 = vld [vmem:[#allocation3] sm:$0x3]  ;;  %v302_v35 = vld [vmem:[#allocation2] sm:$0x1]  ;;  %v265_v44 = vld [vmem:[#allocation8] sm:$0xf] }
  0x34   :  { %145 = vmatprep.subr.mxu0 %v70_v21  ;;  %216 = vmatprep.subr.mxu1 %v72_v24  ;;  %334 = vpush %v302_v35  ;;  %v93_v39 = vld [vmem:[%s486_s2] sm:$0xf]  ;;  %v270_v50 = vrot.slane %v265_v44, %v97_v38  ;;  %v278_v54 = vrot.slane %v265_v44, %v105_v40 }
  0x35   :  { %146 = vmatpush1.msra.mxu0 %v69_v23  ;;  %217 = vmatpush1.msra.mxu1 %v71_v26  ;;  %v98_v43 = vrot.slane %v93_v39, %v97_v38  ;;  %v106_v45 = vrot.slane %v93_v39, %v105_v40  ;;  %v102_v46 = vrot.slane %v93_v39, %v101_v41 }
  0x36   :  { %147 = vmatprep.subr.mxu0 %v66_v25  ;;  %218 = vmatprep.subr.mxu1 %v68_v28  ;;  %v110_v48 = vrot.slane %v93_v39, %v109_v42  ;;  %v274_v57 = vrot.slane %v265_v44, %v101_v41  ;;  %v282_v63 = vrot.slane %v265_v44, %v109_v42 }
  0x37   :  { %148 = vmatpush1.msra.mxu0 %v65_v27  ;;  %219 = vmatpush1.msra.mxu1 %v67_v30 }
  0x38   :  { %149 = vmatprep.subr.mxu0 %v62_v29  ;;  %220 = vmatprep.subr.mxu1 %v64_v32 }
  0x39   :  { %150 = vmatpush1.msra.mxu0 %v61_v31  ;;  %221 = vmatpush1.msra.mxu1 %v63_v34 }
  0x3a   :  { %332 = vmatmul.mubr.msk.f32.vlgmr.msra.gmra.mxu0 %vm115_vm0, %v60_v33  ;;  %333 = vmatmul.mubr.msk.f32.vlgmr.msra.gmra.mxu1 %vm115_vm0, %v60_v33 }
  0x65   :  { %s335_s2 = spop %334 }
  0x66   :  { %v304_v12 = vstv %s335_s2 }
  0xfa   :  { %v185_v47 = vpop.f32.mrf.mxu0  ;;  %v256_v51 = vpop.f32.mrf.mxu1 }
  0xfb   :  { %v186_v49 = vadd.f32 %v185_v47, %v98_v43  ;;  %v257_v53 = vadd.f32 %v256_v51, %v106_v45 }
  0xfc   :  { %v187_v52 = vpop.f32.mrf.mxu0  ;;  %v258_v58 = vpop.f32.mrf.mxu1 }
  0xfd   :  { %v261_v55 = vmax.f32 %v186_v49, 0.0  ;;  %v188_v56 = vadd.f32 %v187_v52, %v102_v46  ;;  %v263_v59 = vmax.f32 %v257_v53, 0.0  ;;  %v259_v60 = vadd.f32 %v258_v58, %v110_v48 }
  0xff   :  { %v287_v61 = vmul.f32 %v270_v50, %v261_v55  ;;  %v262_v62 = vmax.f32 %v188_v56, 0.0  ;;  %v289_v0 = vmul.f32 %v278_v54, %v263_v59  ;;  %v264_v1 = vmax.f32 %v259_v60, 0.0 }
 0x101   :  { %v288_v2 = vmul.f32 %v274_v57, %v262_v62  ;;  %v290_v3 = vmul.f32 %v282_v63, %v264_v1  ;;  %v292_v4 = vsel %vm291_vm1, %v287_v61, 0.0  ;;  %v295_v6 = vsel %vm291_vm1, %v289_v0, 0.0 }
 0x103   :  { %v293_v5 = vsel %vm291_vm1, %v288_v2, 0.0  ;;  %v298_v9 = vsel %vm297_vm2, %v290_v3, 0.0 }
 0x104   :  { %v294_v7 = vadd.f32 %v293_v5, %v292_v4 }
 0x106   :  { %v296_v8 = vadd.f32 %v295_v6, %v294_v7 }
 0x108   :  { %v299_v10 = vadd.f32 %v298_v9, %v296_v8 }
 0x10a   :  { %300 = vadd.xlane.f32.xlu0 %v299_v10 }
 0x193   :  { %v301_v14 = vpop.xlane.xlu0 %300 }
 0x194   :  { %v305_v15 = vadd.f32 %v304_v12, %v301_v14 }
 0x196   :  { %v312_v16 = vrot.slane %v305_v15, %v311_v13 }
 0x198   :  { %315 = vst.msk [vmem:[#allocation9] sm:$0x1] %vm314_vm3, %v312_v16 }
 0x199   :  { %414 = shalt.err (!%p411_p5)
}
 0x19a   :  { %325 = dma.vmem_to_hbm [thread:$0]  %s323_s11, 16, %s489_s5, [#allocation5]  }
 0x19b   :  { %427 = dma.done.wait [#allocation5], 16  }
 0x19c   :  { %428 = vsyncadd [#allocation5], 4294967280 }
 0x19d   :  { %329 = vsyncpa [#allocation4], 1 }
 0x19e   :  { %330 = vsyncpa [#allocation7], 1 }
 0x19f   :  { %331 = vsyncpa [#allocation5], 1 }

</bundles_post_ra>
